<compile_context>
chip_gen: v5e
topology: v5e:2x2
jax: 0.10.0
libtpu: 0.0.40
codegen_flags: <defaults>
</compile_context>

<pallas_src>
import jax
import jax.numpy as jnp
from jax.experimental import pallas as pl
from jax.experimental.pallas import tpu as pltpu


_MiB = 1024 * 1024
# Per-slab weight budget: 16 MiB => each TensorCore (v7x megacore) holds at
# most a 16 MiB weight half resident; v5e/v6e hold the whole weight in 2 slabs.
_WEIGHT_SLAB_BUDGET = 16 * _MiB
# Total double-buffered VMEM footprint target (safe on v7x's 64 MiB/TC).
_VMEM_FOOTPRINT_BUDGET = 40 * _MiB


def _round_up(x, m):
    return (x + m - 1) // m * m


def _pick_tn(N, K, w_itemsize):
    """Largest 128-multiple divisor of N whose (K, tn) slab fits the budget."""
    if N % 128 == 0:
        cap = min(N, max(128, (_WEIGHT_SLAB_BUDGET // (K * w_itemsize)) // 128 * 128))
        tn = cap
        while tn >= 128:
            if N % tn == 0:
                return tn
            tn -= 128
    # Fallback: non-128-divisible hidden size -> single full-N slab
    # (footprint assert in _matmul rejects it if it would blow VMEM).
    return N


def _oproj_kernel(x_ref, w_ref, o_ref):
    """One (tm, tn) output tile; full K reduction inside the block.

    x_ref: (tm, K) bf16 activations
    w_ref: (K, tn) bf16 weight slab -- (in, out) layout, i.e. K on sublanes /
           N on lanes, the MXU-native RHS layout (no trans_b, no XLU relayout).
           Its block index is constant across the inner M loop, so the slab is
           DMA'd from HBM exactly once and stays VMEM-resident.
    """
    o_ref[...] = jnp.dot(
        x_ref[...], w_ref[...], preferred_element_type=jnp.float32
    ).astype(o_ref.dtype)


def _matmul(x, w, *, out_dtype, tm_hint=512):
    """x: (M, K) bf16, w: (K, N) bf16 (pre-transposed) -> (M, N) out_dtype."""
    M, K = x.shape
    K2, N = w.shape
    assert K == K2, (K, K2)
    out_itemsize = jnp.dtype(out_dtype).itemsize
    x_itemsize = x.dtype.itemsize
    w_itemsize = w.dtype.itemsize

    # ---- tile selection -------------------------------------------------
    tn = _pick_tn(N, K, w_itemsize)
    tm = max(16, min(tm_hint, _round_up(M, 16)))   # decode path: tm == round_up(M,16)

    def footprint(tm_, tn_):
        w_buf = 2 * K * tn_ * w_itemsize                       # weight slab (double-buffered)
        xo_buf = 2 * tm_ * (K * x_itemsize + tn_ * out_itemsize)  # x + out tiles
        return w_buf + xo_buf

    while tm > 16 and footprint(tm, tn) > _VMEM_FOOTPRINT_BUDGET:
        tm = max(16, _round_up(tm // 2, 16))
    fp = footprint(tm, tn)
    assert fp <= 48 * _MiB, (
        f"OProj tiling footprint {fp / _MiB:.1f} MiB exceeds the VMEM budget "
        f"(M={M}, N={N}, K={K}); hidden size needs a secondary tiling path."
    )
    vmem_limit = int(max(32 * _MiB, min(96 * _MiB, fp + 8 * _MiB)))

    # Pad M up to a tile multiple (zero rows, sliced off by the caller's view).
    m_padded = _round_up(M, tm)
    if m_padded != M:
        x = jnp.pad(x, ((0, m_padded - M), (0, 0)))
    n_i = m_padded // tm
    n_j = N // tn

    # ---- cost estimate (actual traffic incl. re-reads) -------------------
    flops = 2 * m_padded * N * K
    bytes_accessed = (
        n_j * m_padded * K * x_itemsize      # activations re-read once per weight slab
        + N * K * w_itemsize                 # weight streamed exactly once
        + m_padded * N * out_itemsize        # output written once
    )

    out = pl.pallas_call(
        _oproj_kernel,
        out_shape=jax.ShapeDtypeStruct((m_padded, N), out_dtype),
        grid_spec=pltpu.PrefetchScalarGridSpec(
            num_scalar_prefetch=0,
            # N axis outermost so the weight slab's block index is constant
            # across the whole inner M loop (fetched once, stays resident);
            # on v7x megacore the parallel N axis splits the slabs per-core.
            grid=(n_j, n_i),
            in_specs=[
                pl.BlockSpec((tm, K), lambda j, i: (i, 0)),   # activations
                pl.BlockSpec((K, tn), lambda j, i: (0, j)),   # resident weight slab
            ],
            out_specs=pl.BlockSpec((tm, tn), lambda j, i: (i, j)),  # lane-dense (tn>=128)
        ),
        compiler_params=pltpu.CompilerParams(
            dimension_semantics=("parallel", "parallel"),
            vmem_limit_bytes=vmem_limit,
        ),
        cost_estimate=pl.CostEstimate(
            flops=flops, transcendentals=0, bytes_accessed=bytes_accessed
        ),
    )(x, w)

    if m_padded != M:
        out = out[:M]
    return out


def prepare_oproj_weight(weight):
    """One-time (init-time) weight prep -- do this OUTSIDE the forward path.

    Takes the nn.Linear (out_features, in_features) weight, transposes it to
    (in, out) so the kernel uses the MXU-native K-on-sublane RHS layout, and
    casts it to bf16 once (instead of a 64 MiB read + 32 MiB write HBM pass on
    every forward call).
    """
    return jnp.asarray(weight).T.astype(jnp.bfloat16)


def oproj_forward(activation, weight_kn, *, tm=512):
    """JAX/Pallas equivalent of OProj.forward.

    activation: (B, num_heads, S, head_dim)  or  (B, S, hidden_in)
    weight_kn:  (hidden_in, hidden_out) bf16 -- from prepare_oproj_weight()
    returns:    (B, S, hidden_out), same dtype as the activation.
    """
    out_dtype = activation.dtype

    if activation.ndim == 4:
        # activation.transpose(1, 2).flatten(2); the bf16 cast is fused into
        # the same transpose copy (single HBM pass).
        # TODO(synk): fold this head-transpose into the x BlockSpec so the
        # kernel reads (B, H, S, D) directly and saves this HBM pass entirely.
        b, h, s, d = activation.shape
        activation = jnp.transpose(activation, (0, 2, 1, 3)).reshape(b, s, h * d)

    b, s, hidden_in = activation.shape
    hidden_in_w, hidden_out = weight_kn.shape
    assert hidden_in_w == hidden_in, (hidden_in_w, hidden_in)

    # bf16 operands for the MXU; accumulation is f32 inside the kernel.
    x2d = activation.astype(jnp.bfloat16).reshape(b * s, hidden_in)

    out2d = _matmul(x2d, weight_kn, out_dtype=out_dtype, tm_hint=tm)
    return out2d.reshape(b, s, hidden_out)


if __name__ == "__main__":
    # Small, deterministic example consistent with the module:
    # hidden = num_heads * head_dim = 4 * 64 = 256 (the real module uses 4096).
    batch, num_heads, seq, head_dim = 2, 4, 8, 64
    hidden = num_heads * head_dim

    key = jax.random.PRNGKey(0)
    k_act, k_w = jax.random.split(key)

    activation = jax.random.normal(
        k_act, (batch, num_heads, seq, head_dim), dtype=jnp.float32
    )
    # nn.Linear(hidden, hidden, bias=False) weight: (out_features, in_features)
    weight = jax.random.normal(k_w, (hidden, hidden), dtype=jnp.float32) * 0.02

    # One-time weight prep (init time, outside the hot path / outside jit).
    w_kn = prepare_oproj_weight(weight)

    fwd = jax.jit(oproj_forward)
    out = jax.block_until_ready(fwd(activation, w_kn))

    # Reference (same math: bf16-rounded operands, f32 accumulation).
    x_flat = jnp.transpose(activation, (0, 2, 1, 3)).reshape(batch, seq, hidden)
    x_bf = x_flat.astype(jnp.bfloat16).astype(jnp.float32)
    w_bf = weight.astype(jnp.bfloat16).astype(jnp.float32)
    ref = jnp.einsum(
        "bsk,nk->bsn", x_bf, w_bf, precision=jax.lax.Precision.HIGHEST
    )

    assert out.shape == (batch, seq, hidden)
    assert out.dtype == activation.dtype
    assert jnp.allclose(out.astype(jnp.float32), ref, atol=1e-2, rtol=1e-2)

    print("KERNEL_OK")
</pallas_src>

<mosaic_0001>
module attributes {stable_mosaic.version = 11 : i64} {
  func.func @_oproj_kernel(%arg0: i32, %arg1: i32, %arg2: memref<16x256xbf16, #tpu.memory_space<vmem>>, %arg3: memref<256x256xbf16, #tpu.memory_space<vmem>>, %arg4: memref<16x256xf32, #tpu.memory_space<vmem>>) attributes {dimension_semantics = [#tpu.dimension_semantics<parallel>, #tpu.dimension_semantics<parallel>], iteration_bounds = array<i64: 1, 1>, scalar_prefetch = 0 : i64, scratch_operands = 0 : i64, tpu.core_type = #tpu.core_type<tc>, window_params = [{transform_indices = @transform_0, window_bounds = array<i64: 16, 256>}, {transform_indices = @transform_1, window_bounds = array<i64: 256, 256>}, {transform_indices = @transform_2, window_bounds = array<i64: 16, 256>}]} {
    %c0 = arith.constant 0 : index
    %c0_0 = arith.constant 0 : index
    %0 = vector.load %arg2[%c0, %c0_0] : memref<16x256xbf16, #tpu.memory_space<vmem>>, vector<16x256xbf16>
    %c0_1 = arith.constant 0 : index
    %c0_2 = arith.constant 0 : index
    %1 = vector.load %arg3[%c0_1, %c0_2] : memref<256x256xbf16, #tpu.memory_space<vmem>>, vector<256x256xbf16>
    %cst = arith.constant dense<0.000000e+00> : vector<16x256xf32>
    %2 = tpu.matmul %0, %1, %cst {dimension_numbers = #tpu.dot_dimension_numbers<[1], [0], [0], [1], [0, 0, 1, 1], [], []>} : vector<16x256xbf16>, vector<256x256xbf16>, vector<16x256xf32> -> vector<16x256xf32>
    %c0_3 = arith.constant 0 : index
    %c0_4 = arith.constant 0 : index
    %3 = vector.load %arg4[%c0_3, %c0_4] : memref<16x256xf32, #tpu.memory_space<vmem>>, vector<16x256xf32>
    tpu.vector_store %arg4[%c0_3, %c0_4], %2 {strides = array<i32>} : memref<16x256xf32, #tpu.memory_space<vmem>>, vector<16x256xf32>,
    return
  }
  func.func @transform_0(%arg0: i32, %arg1: i32) -> (i32, i32) {
    %c0_i32 = arith.constant 0 : i32
    %c0_i32_0 = arith.constant 0 : i32
    return %arg1, %c0_i32 : i32, i32
  }
  func.func @transform_1(%arg0: i32, %arg1: i32) -> (i32, i32) {
    %c0_i32 = arith.constant 0 : i32
    %c0_i32_0 = arith.constant 0 : i32
    return %c0_i32, %arg0 : i32, i32
  }
  func.func @transform_2(%arg0: i32, %arg1: i32) -> (i32, i32) {
    %c0_i32 = arith.constant 0 : i32
    return %arg1, %arg0 : i32, i32
  }
}

</mosaic_0001>

<bundles_post_ra>
// kernel: oproj_forward.1
= control target key start
LH: loop header
LB: loop body
LE: loop exit
PB: predicated region body
PF: predicated region fallthrough
CT: control target
= control target key end

     0   :  { %7 = vsyncpa [#allocation3], 0  ;;  %s578_s0 = inlined_call_operand.vmem [shape: bf16[16,256], index: 0, kind: input, shape index: {}]   ;;  %s579_s1 = inlined_call_operand.hbm [shape: bf16[256,256], index: 1, kind: input, shape index: {}]   ;;  %s580_s2 = inlined_call_operand.hbm [shape: f32[16,256], index: 2, kind: output, shape index: {}]  }
   0x1   :  { %8 = vsyncpa [#allocation4], 0  ;;  %s15_s11 = sshll.u32 %s579_s1, 4  ;;  %s539_s12 = smov [#allocation2]   ;;  %s16_s11 = int_to_ptr.hbm [resolvable:$true] %s15_s11 }
   0x2   :  { %s17_s13 = sshll.u32 %s539_s12, 4  ;;  %s540_s14 = smov 128   ;;  %s18_s13 = int_to_ptr.vmem [resolvable:$true] %s17_s13 }
   0x3   :  { %s541_s15 = smov 8  }
   0x4   :  { %23 = dma.hbm_to_vmem [thread:$0]  %s16_s11, 4096, %s18_s13, [#allocation3], %s540_s14, %s540_s14, %s541_s15  }
   0x5   :  { %535 = dma.done.wait [#allocation3], 4096  }
   0x6   :  { %536 = vsyncadd [#allocation3], 4294963200  ;;  %v377_v0 = vld [vmem:[#allocation2 + $0x70] sm:$0xf]  ;;  %v464_v1 = vld [vmem:[#allocation2 + $0x74] sm:$0xf0] }
   0x7   :  { %v441_v2 = vld [vmem:[#allocation2 + $0xf0] sm:$0xf]  ;;  %v378_v3 = vor.u32 %v464_v1, %v377_v0  ;;  %v480_v4 = vld [vmem:[#allocation2 + $0xf4] sm:$0xf0]  ;;  %v463_v5 = vld [vmem:[#allocation2 + $0x74] sm:$0xf] }
   0x8   :  { %v379_v6 = vld [vmem:[#allocation2 + $0x78] sm:$0xf0]  ;;  %v442_v7 = vor.u32 %v480_v4, %v441_v2  ;;  %v479_v9 = vld [vmem:[#allocation2 + $0xf4] sm:$0xf]  ;;  %v369_v11 = vld [vmem:[#allocation2 + $0x60] sm:$0xf] }
   0x9   :  { %v382_v8 = vor.u32 %v463_v5, %v379_v6  ;;  %v443_v10 = vld [vmem:[#allocation2 + $0xf8] sm:$0xf0]  ;;  %232 = vmatpush.bf16.msra.mxu0 %v378_v3  ;;  %v462_v13 = vld [vmem:[#allocation2 + $0x64] sm:$0xf0]  ;;  %v433_v14 = vld [vmem:[#allocation2 + $0xe0] sm:$0xf] }
   0xa   :  { %v446_v12 = vor.u32 %v479_v9, %v443_v10  ;;  %v478_v15 = vld [vmem:[#allocation2 + $0xe4] sm:$0xf0]  ;;  %246 = vmatpush.bf16.msra.mxu1 %v442_v7  ;;  %v370_v16 = vor.u32 %v462_v13, %v369_v11  ;;  %v461_v18 = vld [vmem:[#allocation2 + $0x64] sm:$0xf]  ;;  %v371_v19 = vld [vmem:[#allocation2 + $0x68] sm:$0xf0] }
   0xb   :  { %260 = vmatpush.bf16.msra.mxu2 %v382_v8  ;;  %v434_v17 = vor.u32 %v478_v15, %v433_v14  ;;  %v477_v20 = vld [vmem:[#allocation2 + $0xe4] sm:$0xf]  ;;  %v374_v21 = vor.u32 %v461_v18, %v371_v19  ;;  %v435_v22 = vld [vmem:[#allocation2 + $0xe8] sm:$0xf0]  ;;  %v361_v23 = vld [vmem:[#allocation2 + $0x50] sm:$0xf] }
   0xc   :  { %274 = vmatpush.bf16.msra.mxu3 %v446_v12  ;;  %v460_v24 = vld [vmem:[#allocation2 + $0x54] sm:$0xf0]  ;;  %v438_v25 = vor.u32 %v477_v20, %v435_v22  ;;  %v425_v26 = vld [vmem:[#allocation2 + $0xd0] sm:$0xf]  ;;  %v459_v28 = vld [vmem:[#allocation2 + $0x54] sm:$0xf] }
   0xd   :  { %v476_v27 = vld [vmem:[#allocation2 + $0xd4] sm:$0xf0]  ;;  %233 = vmatpush.bf16.msra.mxu0 %v370_v16  ;;  %v362_v29 = vor.u32 %v460_v24, %v361_v23  ;;  %v363_v30 = vld [vmem:[#allocation2 + $0x58] sm:$0xf0]  ;;  %v475_v31 = vld [vmem:[#allocation2 + $0xd4] sm:$0xf] }
   0xe   :  { %v427_v32 = vld [vmem:[#allocation2 + $0xd8] sm:$0xf0]  ;;  %247 = vmatpush.bf16.msra.mxu1 %v434_v17  ;;  %v426_v33 = vor.u32 %v476_v27, %v425_v26  ;;  %v366_v34 = vor.u32 %v459_v28, %v363_v30  ;;  %v353_v35 = vld [vmem:[#allocation2 + $0x40] sm:$0xf]  ;;  %v458_v36 = vld [vmem:[#allocation2 + $0x44] sm:$0xf0] }
   0xf   :  { %261 = vmatpush.bf16.msra.mxu2 %v374_v21  ;;  %v417_v37 = vld [vmem:[#allocation2 + $0xc0] sm:$0xf]  ;;  %v430_v38 = vor.u32 %v475_v31, %v427_v32  ;;  %v474_v39 = vld [vmem:[#allocation2 + $0xc4] sm:$0xf0]  ;;  %v457_v40 = vld [vmem:[#allocation2 + $0x44] sm:$0xf]  ;;  %v354_v44 = vor.u32 %v458_v36, %v353_v35 }
  0x10   :  { %275 = vmatpush.bf16.msra.mxu3 %v438_v25  ;;  %v355_v41 = vld [vmem:[#allocation2 + $0x48] sm:$0xf0]  ;;  %v473_v42 = vld [vmem:[#allocation2 + $0xc4] sm:$0xf]  ;;  %v418_v45 = vor.u32 %v474_v39, %v417_v37  ;;  %v345_v47 = vld [vmem:[#allocation2 + $0x30] sm:$0xf] }
  0x11   :  { %v419_v43 = vld [vmem:[#allocation2 + $0xc8] sm:$0xf0]  ;;  %234 = vmatpush.bf16.msra.mxu0 %v362_v29  ;;  %v358_v46 = vor.u32 %v457_v40, %v355_v41  ;;  %v456_v48 = vld [vmem:[#allocation2 + $0x34] sm:$0xf0]  ;;  %v409_v49 = vld [vmem:[#allocation2 + $0xb0] sm:$0xf] }
  0x12   :  { %248 = vmatpush.bf16.msra.mxu1 %v426_v33  ;;  %v422_v50 = vor.u32 %v473_v42, %v419_v43  ;;  %v472_v51 = vld [vmem:[#allocation2 + $0xb4] sm:$0xf0]  ;;  %v455_v52 = vld [vmem:[#allocation2 + $0x34] sm:$0xf]  ;;  %v347_v53 = vld [vmem:[#allocation2 + $0x38] sm:$0xf0]  ;;  %v346_v56 = vor.u32 %v456_v48, %v345_v47 }
  0x13   :  { %262 = vmatpush.bf16.msra.mxu2 %v366_v34  ;;  %v471_v54 = vld [vmem:[#allocation2 + $0xb4] sm:$0xf]  ;;  %v411_v55 = vld [vmem:[#allocation2 + $0xb8] sm:$0xf0]  ;;  %v410_v57 = vor.u32 %v472_v51, %v409_v49  ;;  %v350_v58 = vor.u32 %v455_v52, %v347_v53  ;;  %v337_v59 = vld [vmem:[#allocation2 + $0x20] sm:$0xf] }
  0x14   :  { %276 = vmatpush.bf16.msra.mxu3 %v430_v38  ;;  %v454_v60 = vld [vmem:[#allocation2 + $0x24] sm:$0xf0]  ;;  %v401_v61 = vld [vmem:[#allocation2 + $0xa0] sm:$0xf]  ;;  %v414_v62 = vor.u32 %v471_v54, %v411_v55  ;;  %v453_v0 = vld [vmem:[#allocation2 + $0x24] sm:$0xf] }
  0x15   :  { %235 = vmatpush.bf16.msra.mxu0 %v354_v44  ;;  %v470_v63 = vld [vmem:[#allocation2 + $0xa4] sm:$0xf0]  ;;  %v339_v1 = vld [vmem:[#allocation2 + $0x28] sm:$0xf0]  ;;  %v469_v2 = vld [vmem:[#allocation2 + $0xa4] sm:$0xf]  ;;  %v338_v4 = vor.u32 %v454_v60, %v337_v59 }
  0x16   :  { %249 = vmatpush.bf16.msra.mxu1 %v418_v45  ;;  %v403_v3 = vld [vmem:[#allocation2 + $0xa8] sm:$0xf0]  ;;  %v402_v5 = vor.u32 %v470_v63, %v401_v61  ;;  %v342_v6 = vor.u32 %v453_v0, %v339_v1  ;;  %v329_v7 = vld [vmem:[#allocation2 + $0x10] sm:$0xf]  ;;  %v452_v8 = vld [vmem:[#allocation2 + $0x14] sm:$0xf0] }
  0x17   :  { %263 = vmatpush.bf16.msra.mxu2 %v358_v46  ;;  %v393_v9 = vld [vmem:[#allocation2 + $0x90] sm:$0xf]  ;;  %v406_v10 = vor.u32 %v469_v2, %v403_v3  ;;  %v468_v11 = vld [vmem:[#allocation2 + $0x94] sm:$0xf0]  ;;  %v451_v12 = vld [vmem:[#allocation2 + $0x14] sm:$0xf]  ;;  %v330_v16 = vor.u32 %v452_v8, %v329_v7 }
  0x18   :  { %277 = vmatpush.bf16.msra.mxu3 %v422_v50  ;;  %v331_v13 = vld [vmem:[#allocation2 + $0x18] sm:$0xf0]  ;;  %v467_v14 = vld [vmem:[#allocation2 + $0x94] sm:$0xf]  ;;  %v394_v17 = vor.u32 %v468_v11, %v393_v9  ;;  %v321_v19 = vld [vmem:[#allocation2] sm:$0xf] }
  0x19   :  { %236 = vmatpush.bf16.msra.mxu0 %v346_v56  ;;  %v395_v15 = vld [vmem:[#allocation2 + $0x98] sm:$0xf0]  ;;  %v334_v18 = vor.u32 %v451_v12, %v331_v13  ;;  %v450_v20 = vld [vmem:[#allocation2 + $0x4] sm:$0xf0]  ;;  %v385_v21 = vld [vmem:[#allocation2 + $0x80] sm:$0xf] }
  0x1a   :  { %250 = vmatpush.bf16.msra.mxu1 %v410_v57  ;;  %v398_v22 = vor.u32 %v467_v14, %v395_v15  ;;  %v466_v23 = vld [vmem:[#allocation2 + $0x84] sm:$0xf0]  ;;  %v449_v24 = vld [vmem:[#allocation2 + $0x4] sm:$0xf]  ;;  %v323_v25 = vld [vmem:[#allocation2 + $0x8] sm:$0xf0]  ;;  %v322_v28 = vor.u32 %v450_v20, %v321_v19 }
  0x1b   :  { %264 = vmatpush.bf16.msra.mxu2 %v350_v58  ;;  %v465_v26 = vld [vmem:[#allocation2 + $0x84] sm:$0xf]  ;;  %v387_v27 = vld [vmem:[#allocation2 + $0x88] sm:$0xf0]  ;;  %v313_v29 = vld [vmem:[%s578_s0] sm:$0xf]  ;;  %v386_v31 = vor.u32 %v466_v23, %v385_v21  ;;  %v326_v32 = vor.u32 %v449_v24, %v323_v25 }
  0x1c   :  { %278 = vmatpush.bf16.msra.mxu3 %v414_v62  ;;  %v448_v30 = vld [vmem:[%s578_s0 + $0x4] sm:$0xf0]  ;;  %v447_v33 = vld [vmem:[%s578_s0 + $0x4] sm:$0xf]  ;;  %v315_v34 = vld [vmem:[%s578_s0 + $0x8] sm:$0xf0]  ;;  %v390_v35 = vor.u32 %v465_v26, %v387_v27 }
  0x1d   :  { %237 = vmatpush.bf16.msra.mxu0 %v338_v4  ;;  %v314_v36 = vor.u32 %v448_v30, %v313_v29  ;;  %v318_v37 = vor.u32 %v447_v33, %v315_v34  ;;  %s542_s0 = smov [#allocation5]   ;;  %s298_s26 = sshll.u32 %s580_s2, 4  ;;  %s299_s26 = int_to_ptr.hbm [resolvable:$true] %s298_s26 }
  0x1e   :  { %251 = vmatpush.bf16.msra.mxu1 %v402_v5  ;;  %s296_s23 = sshll.u32 %s542_s0, 4  ;;  %s543_s27 = smov 256   ;;  %s297_s23 = int_to_ptr.vmem [resolvable:$true] %s296_s23 }
  0x1f   :  { %265 = vmatpush.bf16.msra.mxu2 %v342_v6  ;;  %s544_s28 = smov 16  }
  0x20   :  { %279 = vmatpush.bf16.msra.mxu3 %v406_v10 }
  0x21   :  { %238 = vmatpush.bf16.msra.mxu0 %v330_v16 }
  0x22   :  { %252 = vmatpush.bf16.msra.mxu1 %v394_v17 }
  0x23   :  { %266 = vmatpush.bf16.msra.mxu2 %v334_v18 }
  0x24   :  { %280 = vmatpush.bf16.msra.mxu3 %v398_v22 }
  0x25   :  { %239 = vmatpush.bf16.msra.mxu0 %v322_v28 }
  0x26   :  { %253 = vmatpush.bf16.msra.mxu1 %v386_v31 }
  0x27   :  { %267 = vmatpush.bf16.msra.mxu2 %v326_v32 }
  0x28   :  { %281 = vmatpush.bf16.msra.mxu3 %v390_v35  ;;  %240 = vmatmul.bf16.vlgmr.msra.gmra.mxu0 %v314_v36 }
  0x29   :  { %254 = vmatmul.bf16.vlgmr.msra.gmra.mxu1 %v318_v37 }
  0x2a   :  { %268 = vmatmul.bf16.vlgmr.msra.gmra.mxu2 %v314_v36 }
  0x2b   :  { %282 = vmatmul.bf16.vlgmr.msra.gmra.mxu3 %v318_v37 }
  0xa5   :  { %v241_v38 = vpop.f32.mrf.mxu0 }
  0xa6   :  { %v255_v39 = vpop.f32.mrf.mxu1 }
  0xa7   :  { %v256_v40 = vadd.f32 %v255_v39, %v241_v38 }
  0xa9   :  { %288 = vst [vmem:[#allocation5] sm:$0xff] %v256_v40 }
  0xad   :  { %v269_v41 = vpop.f32.mrf.mxu2  ;;  %v243_v43 = vpop.f32.mrf.mxu0 }
  0xae   :  { %v283_v42 = vpop.f32.mrf.mxu3  ;;  %v257_v45 = vpop.f32.mrf.mxu1 }
  0xaf   :  { %v284_v44 = vadd.f32 %v283_v42, %v269_v41  ;;  %v258_v46 = vadd.f32 %v257_v45, %v243_v43 }
  0xb1   :  { %289 = vst [vmem:[#allocation5 + $0x8] sm:$0xff] %v284_v44 }
  0xb2   :  { %290 = vst [vmem:[#allocation5 + $0x10] sm:$0xff] %v258_v46 }
  0xb5   :  { %v271_v47 = vpop.f32.mrf.mxu2 }
  0xb6   :  { %v285_v48 = vpop.f32.mrf.mxu3 }
  0xb7   :  { %v286_v49 = vadd.f32 %v285_v48, %v271_v47 }
  0xb9   :  { %291 = vst [vmem:[#allocation5 + $0x18] sm:$0xff] %v286_v49 }
  0xba   :  { %304 = dma.vmem_to_hbm [thread:$0]  %s297_s23, 512, %s299_s26, [#allocation4], %s543_s27, %s543_s27, %s544_s28  }
  0xbb   :  { %537 = dma.done.wait [#allocation4], 512  }
  0xbc   :  { %538 = vsyncadd [#allocation4], 4294966784 }
  0xbd   :  { %309 = vsyncpa [#allocation3], 1 }
  0xbe   :  { %310 = vsyncpa [#allocation4], 1 }

</bundles_post_ra>
